<compile_context>
chip_gen: v6e
topology: v6e:2x2x1
jax: 0.10.0
libtpu: 0.0.40
codegen_flags: <defaults>
</compile_context>

<pallas_src>
import math
import numpy as np
import jax
import jax.numpy as jnp
from jax.experimental import pallas as pl
from jax.experimental.pallas import tpu as pltpu

# ----------------------------- tiny Llama config -----------------------------
BATCH = 2
SEQ = 8
HIDDEN = 32
NUM_HEADS = 4
HEAD_DIM = HIDDEN // NUM_HEADS          # 8
INTERMEDIATE = 64
RMS_EPS = 1e-6
ROPE_THETA = 10000.0
KV_ROWS = NUM_HEADS * SEQ               # flattened (head, key-position) axis in-kernel

# ------------------- static layout tables (built once, host side) -------------------
_half = HEAD_DIM // 2
# Permutation of q/k projection columns into "halves-blocked" order:
# columns [0, H/2)  = first rotary half of every head, columns [H/2, H) = second half.
_first = (np.repeat(np.arange(NUM_HEADS), _half) * HEAD_DIM
          + np.tile(np.arange(_half), NUM_HEADS))
PERM = np.concatenate([_first, _first + _half]).astype(np.int32)          # (HIDDEN,)
SIGN = np.concatenate([-np.ones(HIDDEN // 2, np.float32),
                       np.ones(HIDDEN // 2, np.float32)])                 # (HIDDEN,)

_row = np.arange(KV_ROWS)[:, None]       # key-row block h = row // SEQ
_col = np.arange(HIDDEN)[None, :]
# 1 where column d (permuted q/k layout) belongs to head (row // SEQ)
HEADMASK = (((_col % (HIDDEN // 2)) // _half) == (_row // SEQ)).astype(np.float32)
# 1 where column d (original head-contiguous v/output layout) belongs to head (row // SEQ)
VMASK = ((_col // HEAD_DIM) == (_row // SEQ)).astype(np.float32)
# block-diagonal ones: per-head-block softmax denominator via one matmul
_t = np.arange(KV_ROWS)
BLOCKSUM = ((_t[:, None] // SEQ) == (_t[None, :] // SEQ)).astype(np.float32)


# ------------------------------- Pallas kernel --------------------------------
def decoder_layer_kernel(x_ref, mask_ref, cos_ref, sin_ref,
                         wqkv_ref, wo_ref, wgu_ref, wd_ref,
                         ln1_ref, ln2_ref,
                         hmask_ref, vmask_ref, bsum_ref,
                         out_ref):
    f32, bf16 = jnp.float32, jnp.bfloat16
    B, S, H, T = BATCH, SEQ, HIDDEN, KV_ROWS
    BS = B * S

    x = x_ref[...].reshape(BS, H)                                 # (16, 32) f32

    # ---- input RMSNorm (f32 VPU) ----
    var = jnp.mean(x * x, axis=-1, keepdims=True)
    xn = x * jax.lax.rsqrt(var + RMS_EPS) * ln1_ref[...]

    # ---- fused QKV projection (one MXU push; 1/sqrt(Dh) folded into Wq) ----
    qkv = jnp.dot(xn.astype(bf16), wqkv_ref[...],
                  preferred_element_type=f32)                     # (16, 96)
    q, k, v = qkv[:, :H], qkv[:, H:2 * H], qkv[:, 2 * H:]

    # ---- RoPE for all heads at once: q/k columns are halves-blocked, so
    #      rotate_half == swap of the two 16-lane halves; sign folded into sin table.
    cos, sin = cos_ref[...], sin_ref[...]
    HH = H // 2
    q = q * cos + jnp.concatenate([q[:, HH:], q[:, :HH]], axis=-1) * sin
    k = k * cos + jnp.concatenate([k[:, HH:], k[:, :HH]], axis=-1) * sin

    # ---- attention for all (batch, head) pairs via block-masked batched matmuls ----
    q3 = q.reshape(B, S, H).astype(bf16)                          # (B, S, H)
    k3 = k.reshape(B, S, H)
    v3 = v.reshape(B, S, H)
    # expanded keys/values: rows ordered (head, key_pos); other heads' dims zeroed
    kexp = (jnp.concatenate([k3] * NUM_HEADS, axis=1) * hmask_ref[...]).astype(bf16)  # (B,T,H)
    vexp = (jnp.concatenate([v3] * NUM_HEADS, axis=1) * vmask_ref[...]).astype(bf16)  # (B,T,H)

    scores = jnp.einsum('bqd,btd->bqt', q3, kexp,
                        preferred_element_type=f32) + mask_ref[...]       # (B, S, T)
    # per-row max is constant within every head block -> valid stabilizer
    scores = scores - jnp.max(scores, axis=-1, keepdims=True)
    p = jnp.exp(scores).reshape(BS, T)
    # per-head-block denominator, broadcast across the block, via a 0/1 matmul
    denom = jnp.dot(p, bsum_ref[...], preferred_element_type=f32)         # (BS, T)
    pn = (p * pl.reciprocal(denom, approx=True)).reshape(B, S, T)
    ctx = jnp.einsum('bqt,btd->bqd', pn.astype(bf16), vexp,
                     preferred_element_type=f32)                          # (B, S, H)
    attn = jnp.dot(ctx.reshape(BS, H).astype(bf16), wo_ref[...],
                   preferred_element_type=f32)                            # (16, 32)

    # ---- residual 1 + post-attention RMSNorm ----
    h1 = x + attn
    var2 = jnp.mean(h1 * h1, axis=-1, keepdims=True)
    hn = h1 * jax.lax.rsqrt(var2 + RMS_EPS) * ln2_ref[...]

    # ---- SwiGLU MLP with fused (gate|up) weight: exactly 128 output lanes ----
    gu = jnp.dot(hn.astype(bf16), wgu_ref[...], preferred_element_type=f32)   # (16, 128)
    g, u = gu[:, :INTERMEDIATE], gu[:, INTERMEDIATE:]
    mlp = jnp.dot((g * jax.nn.sigmoid(g) * u).astype(bf16), wd_ref[...],
                  preferred_element_type=f32)                                 # (16, 32)

    out_ref[...] = (h1 + mlp).reshape(B, S, H)


# ------------------------- one-time parameter preparation -------------------------
def prepare_params(params):
    """Fold scale/permutation into the weights and fuse them (done once, not per call)."""
    scale = 1.0 / math.sqrt(HEAD_DIM)
    wq_p = params["wq"][:, PERM] * scale          # scale folded into Wq
    wk_p = params["wk"][:, PERM]
    wqkv = jnp.concatenate([wq_p, wk_p, params["wv"]], axis=1).astype(jnp.bfloat16)
    wgu = jnp.concatenate([params["wg"], params["wu"]], axis=1).astype(jnp.bfloat16)
    return {
        "wqkv": wqkv,
        "wo": params["wo"].astype(jnp.bfloat16),
        "wgu": wgu,
        "wd": params["wd"].astype(jnp.bfloat16),
        "ln1": params["ln1"].astype(jnp.float32),
        "ln2": params["ln2"].astype(jnp.float32),
        "headmask": jnp.asarray(HEADMASK),
        "vmask": jnp.asarray(VMASK),
        "blocksum": jnp.asarray(BLOCKSUM),
    }


def _rope_tables(position_ids):
    """cos / signed-sin tables of shape (B*S, H) in the permuted q/k column layout."""
    B, S = position_ids.shape
    inv_freq = 1.0 / (ROPE_THETA ** (jnp.arange(0, HEAD_DIM, 2, dtype=jnp.float32) / HEAD_DIM))
    freqs = position_ids.astype(jnp.float32)[..., None] * inv_freq[None, None, :]   # (B,S,Dh/2)
    emb = jnp.concatenate([freqs, freqs], axis=-1)                                   # (B,S,Dh)
    cos = jnp.tile(jnp.cos(emb), (1, 1, NUM_HEADS))[..., PERM]                       # (B,S,H)
    sin = jnp.tile(jnp.sin(emb), (1, 1, NUM_HEADS))[..., PERM] * SIGN
    return cos.reshape(B * S, HIDDEN), sin.reshape(B * S, HIDDEN)


# --------------------------------- wrapper ------------------------------------
def llama_decoder_layer_with_pipe(hidden_states, attention_mask, position_ids, prep):
    """Mirrors LlamaDecoderLayerwithPipe.forward: returns
    (new_hidden_states, attention_mask, position_ids)."""
    B, S, H = hidden_states.shape
    assert (B, S, H) == (BATCH, SEQ, HIDDEN)

    cos_t, sin_t = _rope_tables(position_ids)
    # HF-style additive mask (B,1,S,S) -> (B,S,NH*S): the same (S,S) mask per head block.
    mask_tiled = jnp.tile(attention_mask.reshape(B, S, S), (1, 1, NUM_HEADS))

    def full_spec(shape):
        zeros = (0,) * len(shape)
        return pl.BlockSpec(shape, lambda i: zeros)

    out = pl.pallas_call(
        decoder_layer_kernel,
        out_shape=jax.ShapeDtypeStruct((B, S, H), jnp.float32),
        grid=(1,),   # single step: whole problem fits in VMEM; avoids per-step overhead
        in_specs=[
            full_spec((B, S, H)),                      # hidden_states
            full_spec((B, S, KV_ROWS)),                # tiled additive mask
            full_spec((B * S, H)),                     # cos (permuted layout)
            full_spec((B * S, H)),                     # signed sin (permuted layout)
            full_spec((H, 3 * H)),                     # fused Wq|Wk|Wv (bf16)
            full_spec((H, H)),                         # Wo (bf16)
            full_spec((H, 2 * INTERMEDIATE)),          # fused Wgate|Wup (bf16)
            full_spec((INTERMEDIATE, H)),              # Wdown (bf16)
            full_spec((1, H)),                         # input layernorm weight
            full_spec((1, H)),                         # post-attn layernorm weight
            full_spec((KV_ROWS, H)),                   # head mask (q/k layout)
            full_spec((KV_ROWS, H)),                   # head mask (v/out layout)
            full_spec((KV_ROWS, KV_ROWS)),             # block-sum matrix
        ],
        out_specs=full_spec((B, S, H)),
        compiler_params=pltpu.CompilerParams(dimension_semantics=("arbitrary",)),
    )(hidden_states, mask_tiled, cos_t, sin_t,
      prep["wqkv"], prep["wo"], prep["wgu"], prep["wd"],
      prep["ln1"], prep["ln2"],
      prep["headmask"], prep["vmask"], prep["blocksum"])

    return out, attention_mask, position_ids


# ---------------------------- pure-JAX reference -------------------------------
def reference_layer(x, mask4d, position_ids, params):
    B, S, H = x.shape
    inv_freq = 1.0 / (ROPE_THETA ** (jnp.arange(0, HEAD_DIM, 2, dtype=jnp.float32) / HEAD_DIM))
    freqs = position_ids.astype(jnp.float32)[..., None] * inv_freq[None, None, :]
    emb = jnp.concatenate([freqs, freqs], axis=-1)
    cos, sin = jnp.cos(emb)[:, None], jnp.sin(emb)[:, None]       # (B,1,S,Dh)

    def rmsnorm(v, w):
        return v * jax.lax.rsqrt(jnp.mean(v * v, -1, keepdims=True) + RMS_EPS) * w[0]

    xn = rmsnorm(x, params["ln1"])

    def split_heads(t):
        return t.reshape(B, S, NUM_HEADS, HEAD_DIM).transpose(0, 2, 1, 3)

    q, k, v = (split_heads(xn @ params[n]) for n in ("wq", "wk", "wv"))
    half = HEAD_DIM // 2
    rot = lambda t: jnp.concatenate([-t[..., half:], t[..., :half]], axis=-1)
    q = q * cos + rot(q) * sin
    k = k * cos + rot(k) * sin
    scores = jnp.einsum("bhqd,bhkd->bhqk", q, k) / math.sqrt(HEAD_DIM) + mask4d
    p = jax.nn.softmax(scores, axis=-1)
    attn = jnp.einsum("bhqk,bhkd->bhqd", p, v).transpose(0, 2, 1, 3).reshape(B, S, H)
    h1 = x + attn @ params["wo"]
    hn = rmsnorm(h1, params["ln2"])
    g = hn @ params["wg"]
    return h1 + (g * jax.nn.sigmoid(g) * (hn @ params["wu"])) @ params["wd"]


# ----------------------------------- main --------------------------------------
if __name__ == "__main__":
    key = jax.random.PRNGKey(0)
    keys = jax.random.split(key, 10)

    init = lambda k, shp: (0.02 * jax.random.normal(k, shp)).astype(jnp.float32)
    params = {
        "wq": init(keys[0], (HIDDEN, HIDDEN)),
        "wk": init(keys[1], (HIDDEN, HIDDEN)),
        "wv": init(keys[2], (HIDDEN, HIDDEN)),
        "wo": init(keys[3], (HIDDEN, HIDDEN)),
        "wg": init(keys[4], (HIDDEN, INTERMEDIATE)),
        "wu": init(keys[5], (HIDDEN, INTERMEDIATE)),
        "wd": init(keys[6], (INTERMEDIATE, HIDDEN)),
        "ln1": jnp.ones((1, HIDDEN), jnp.float32),
        "ln2": jnp.ones((1, HIDDEN), jnp.float32),
    }

    hidden_states = jax.random.normal(keys[7], (BATCH, SEQ, HIDDEN), jnp.float32)
    position_ids = jnp.broadcast_to(jnp.arange(SEQ, dtype=jnp.int32)[None, :], (BATCH, SEQ))

    # HF-style 4D additive causal mask: 0 where attending, large negative otherwise.
    causal = jnp.tril(jnp.ones((SEQ, SEQ), jnp.float32))
    attention_mask = jnp.where(causal[None, None] > 0, 0.0, -1e9).astype(jnp.float32)
    attention_mask = jnp.broadcast_to(attention_mask, (BATCH, 1, SEQ, SEQ))

    prep = prepare_params(params)
    out_hidden, out_mask, out_pos = llama_decoder_layer_with_pipe(
        hidden_states, attention_mask, position_ids, prep)
    out_hidden = jax.block_until_ready(out_hidden)

    ref = reference_layer(hidden_states, attention_mask, position_ids, params)
    assert out_hidden.shape == (BATCH, SEQ, HIDDEN)
    # bf16 MXU operands + approximate reciprocal -> slightly looser tolerance than pure f32.
    assert jnp.allclose(out_hidden, ref, atol=2e-3, rtol=2e-3), "mismatch vs reference"
    assert out_mask.shape == attention_mask.shape and out_pos.shape == position_ids.shape

    print("KERNEL_OK")
</pallas_src>

<mosaic_0001>
module attributes {stable_mosaic.version = 11 : i64} {
  func.func @decoder_layer_kernel(%arg0: i32, %arg1: memref<2x8x32xf32, #tpu.memory_space<vmem>>, %arg2: memref<2x8x32xf32, #tpu.memory_space<vmem>>, %arg3: memref<16x32xf32, #tpu.memory_space<vmem>>, %arg4: memref<16x32xf32, #tpu.memory_space<vmem>>, %arg5: memref<32x96xbf16, #tpu.memory_space<vmem>>, %arg6: memref<32x32xbf16, #tpu.memory_space<vmem>>, %arg7: memref<32x128xbf16, #tpu.memory_space<vmem>>, %arg8: memref<64x32xbf16, #tpu.memory_space<vmem>>, %arg9: memref<1x32xf32, #tpu.memory_space<vmem>>, %arg10: memref<1x32xf32, #tpu.memory_space<vmem>>, %arg11: memref<32x32xf32, #tpu.memory_space<vmem>>, %arg12: memref<32x32xf32, #tpu.memory_space<vmem>>, %arg13: memref<32x32xf32, #tpu.memory_space<vmem>>, %arg14: memref<2x8x32xf32, #tpu.memory_space<vmem>>) attributes {dimension_semantics = [#tpu.dimension_semantics<arbitrary>], iteration_bounds = array<i64: 1>, scalar_prefetch = 0 : i64, scratch_operands = 0 : i64, tpu.core_type = #tpu.core_type<tc>, window_params = [{pipeline_mode = #tpu.pipeline_mode<synchronous>, transform_indices = @transform_0, window_bounds = array<i64: 2, 8, 32>}, {pipeline_mode = #tpu.pipeline_mode<synchronous>, transform_indices = @transform_1, window_bounds = array<i64: 2, 8, 32>}, {pipeline_mode = #tpu.pipeline_mode<synchronous>, transform_indices = @transform_2, window_bounds = array<i64: 16, 32>}, {pipeline_mode = #tpu.pipeline_mode<synchronous>, transform_indices = @transform_3, window_bounds = array<i64: 16, 32>}, {pipeline_mode = #tpu.pipeline_mode<synchronous>, transform_indices = @transform_4, window_bounds = array<i64: 32, 96>}, {pipeline_mode = #tpu.pipeline_mode<synchronous>, transform_indices = @transform_5, window_bounds = array<i64: 32, 32>}, {pipeline_mode = #tpu.pipeline_mode<synchronous>, transform_indices = @transform_6, window_bounds = array<i64: 32, 128>}, {pipeline_mode = #tpu.pipeline_mode<synchronous>, transform_indices = @transform_7, window_bounds = array<i64: 64, 32>}, {pipeline_mode = #tpu.pipeline_mode<synchronous>, transform_indices = @transform_8, window_bounds = array<i64: 1, 32>}, {pipeline_mode = #tpu.pipeline_mode<synchronous>, transform_indices = @transform_9, window_bounds = array<i64: 1, 32>}, {pipeline_mode = #tpu.pipeline_mode<synchronous>, transform_indices = @transform_10, window_bounds = array<i64: 32, 32>}, {pipeline_mode = #tpu.pipeline_mode<synchronous>, transform_indices = @transform_11, window_bounds = array<i64: 32, 32>}, {pipeline_mode = #tpu.pipeline_mode<synchronous>, transform_indices = @transform_12, window_bounds = array<i64: 32, 32>}, {pipeline_mode = #tpu.pipeline_mode<synchronous>, transform_indices = @transform_13, window_bounds = array<i64: 2, 8, 32>}]} {
    %c0 = arith.constant 0 : index
    %c0_0 = arith.constant 0 : index
    %c0_1 = arith.constant 0 : index
    %0 = vector.load %arg1[%c0, %c0_0, %c0_1] : memref<2x8x32xf32, #tpu.memory_space<vmem>>, vector<2x8x32xf32>
    %1 = vector.shape_cast %0 : vector<2x8x32xf32> to vector<16x32xf32>
    %2 = arith.mulf %1, %1 : vector<16x32xf32>
    %cst = arith.constant dense<0.000000e+00> : vector<16xf32>
    %3 = vector.multi_reduction <add>, %2, %cst [1] : vector<16x32xf32> to vector<16xf32>
    %4 = vector.shape_cast %3 : vector<16xf32> to vector<16x1xf32>
    %cst_2 = arith.constant 3.200000e+01 : f32
    %5 = vector.broadcast %cst_2 : f32 to vector<16x1xf32>
    %6 = arith.divf %4, %5 : vector<16x1xf32>
    %cst_3 = arith.constant 9.99999997E-7 : f32
    %7 = vector.broadcast %cst_3 : f32 to vector<16x1xf32>
    %8 = arith.addf %6, %7 : vector<16x1xf32>
    %9 = math.rsqrt %8 : vector<16x1xf32>
    %10 = vector.broadcast %9 : vector<16x1xf32> to vector<16x32xf32>
    %11 = arith.mulf %1, %10 : vector<16x32xf32>
    %c0_4 = arith.constant 0 : index
    %c0_5 = arith.constant 0 : index
    %12 = vector.load %arg9[%c0_4, %c0_5] : memref<1x32xf32, #tpu.memory_space<vmem>>, vector<1x32xf32>
    %13 = vector.broadcast %12 : vector<1x32xf32> to vector<16x32xf32>
    %14 = arith.mulf %11, %13 : vector<16x32xf32>
    %15 = arith.truncf %14 : vector<16x32xf32> to vector<16x32xbf16>
    %c0_6 = arith.constant 0 : index
    %c0_7 = arith.constant 0 : index
    %16 = vector.load %arg5[%c0_6, %c0_7] : memref<32x96xbf16, #tpu.memory_space<vmem>>, vector<32x96xbf16>
    %cst_8 = arith.constant dense<0.000000e+00> : vector<16x96xf32>
    %17 = tpu.matmul %15, %16, %cst_8 {dimension_numbers = #tpu.dot_dimension_numbers<[1], [0], [0], [1], [0, 0, 1, 1], [], []>} : vector<16x32xbf16>, vector<32x96xbf16>, vector<16x96xf32> -> vector<16x96xf32>
    %18 = vector.extract_strided_slice %17 {offsets = [0, 0], sizes = [16, 32], strides = [1, 1]} : vector<16x96xf32> to vector<16x32xf32>
    %19 = vector.extract_strided_slice %17 {offsets = [0, 32], sizes = [16, 32], strides = [1, 1]} : vector<16x96xf32> to vector<16x32xf32>
    %20 = vector.extract_strided_slice %17 {offsets = [0, 64], sizes = [16, 32], strides = [1, 1]} : vector<16x96xf32> to vector<16x32xf32>
    %c0_9 = arith.constant 0 : index
    %c0_10 = arith.constant 0 : index
    %21 = vector.load %arg3[%c0_9, %c0_10] : memref<16x32xf32, #tpu.memory_space<vmem>>, vector<16x32xf32>
    %c0_11 = arith.constant 0 : index
    %c0_12 = arith.constant 0 : index
    %22 = vector.load %arg4[%c0_11, %c0_12] : memref<16x32xf32, #tpu.memory_space<vmem>>, vector<16x32xf32>
    %23 = arith.mulf %18, %21 : vector<16x32xf32>
    %24 = vector.extract_strided_slice %18 {offsets = [0, 16], sizes = [16, 16], strides = [1, 1]} : vector<16x32xf32> to vector<16x16xf32>
    %25 = vector.extract_strided_slice %18 {offsets = [0, 0], sizes = [16, 16], strides = [1, 1]} : vector<16x32xf32> to vector<16x16xf32>
    %26 = tpu.concatenate %24, %25 in 1 : vector<16x16xf32>, vector<16x16xf32> -> vector<16x32xf32>
    %27 = arith.mulf %26, %22 : vector<16x32xf32>
    %28 = arith.addf %23, %27 : vector<16x32xf32>
    %29 = arith.mulf %19, %21 : vector<16x32xf32>
    %30 = vector.extract_strided_slice %19 {offsets = [0, 16], sizes = [16, 16], strides = [1, 1]} : vector<16x32xf32> to vector<16x16xf32>
    %31 = vector.extract_strided_slice %19 {offsets = [0, 0], sizes = [16, 16], strides = [1, 1]} : vector<16x32xf32> to vector<16x16xf32>
    %32 = tpu.concatenate %30, %31 in 1 : vector<16x16xf32>, vector<16x16xf32> -> vector<16x32xf32>
    %33 = arith.mulf %32, %22 : vector<16x32xf32>
    %34 = arith.addf %29, %33 : vector<16x32xf32>
    %35 = vector.shape_cast %28 : vector<16x32xf32> to vector<2x8x32xf32>
    %36 = arith.truncf %35 : vector<2x8x32xf32> to vector<2x8x32xbf16>
    %37 = vector.shape_cast %34 : vector<16x32xf32> to vector<2x8x32xf32>
    %38 = vector.shape_cast %20 : vector<16x32xf32> to vector<2x8x32xf32>
    %39 = tpu.concatenate %37, %37, %37, %37 in 1 : vector<2x8x32xf32>, vector<2x8x32xf32>, vector<2x8x32xf32>, vector<2x8x32xf32> -> vector<2x32x32xf32>
    %c0_13 = arith.constant 0 : index
    %c0_14 = arith.constant 0 : index
    %40 = vector.load %arg11[%c0_13, %c0_14] : memref<32x32xf32, #tpu.memory_space<vmem>>, vector<32x32xf32>
    %41 = vector.shape_cast %40 : vector<32x32xf32> to vector<1x32x32xf32>
    %42 = vector.broadcast %41 : vector<1x32x32xf32> to vector<2x32x32xf32>
    %43 = arith.mulf %39, %42 : vector<2x32x32xf32>
    %44 = arith.truncf %43 : vector<2x32x32xf32> to vector<2x32x32xbf16>
    %45 = tpu.concatenate %38, %38, %38, %38 in 1 : vector<2x8x32xf32>, vector<2x8x32xf32>, vector<2x8x32xf32>, vector<2x8x32xf32> -> vector<2x32x32xf32>
    %c0_15 = arith.constant 0 : index
    %c0_16 = arith.constant 0 : index
    %46 = vector.load %arg12[%c0_15, %c0_16] : memref<32x32xf32, #tpu.memory_space<vmem>>, vector<32x32xf32>
    %47 = vector.shape_cast %46 : vector<32x32xf32> to vector<1x32x32xf32>
    %48 = vector.broadcast %47 : vector<1x32x32xf32> to vector<2x32x32xf32>
    %49 = arith.mulf %45, %48 : vector<2x32x32xf32>
    %50 = arith.truncf %49 : vector<2x32x32xf32> to vector<2x32x32xbf16>
    "tpu.trace_start"() <{level = 10 : i32, message = "bqd,btd->bqt"}> : () -> ()
    %cst_17 = arith.constant dense<0.000000e+00> : vector<2x8x32xf32>
    %51 = tpu.matmul %36, %44, %cst_17 {dimension_numbers = #tpu.dot_dimension_numbers<[2], [2], [1], [1], [0, 0, 0, 1, 1, 1], [0], [0]>} : vector<2x8x32xbf16>, vector<2x32x32xbf16>, vector<2x8x32xf32> -> vector<2x8x32xf32>
    "tpu.trace_stop"() : () -> ()
    %c0_18 = arith.constant 0 : index
    %c0_19 = arith.constant 0 : index
    %c0_20 = arith.constant 0 : index
    %52 = vector.load %arg2[%c0_18, %c0_19, %c0_20] : memref<2x8x32xf32, #tpu.memory_space<vmem>>, vector<2x8x32xf32>
    %53 = arith.addf %51, %52 : vector<2x8x32xf32>
    %cst_21 = arith.constant dense<0xFF800000> : vector<2x8xf32>
    %54 = vector.multi_reduction <maximumf>, %53, %cst_21 [2] : vector<2x8x32xf32> to vector<2x8xf32>
    %55 = vector.shape_cast %54 : vector<2x8xf32> to vector<2x8x1xf32>
    %56 = vector.broadcast %55 : vector<2x8x1xf32> to vector<2x8x32xf32>
    %57 = arith.subf %53, %56 : vector<2x8x32xf32>
    %58 = math.exp %57 : vector<2x8x32xf32>
    %59 = vector.shape_cast %58 : vector<2x8x32xf32> to vector<16x32xf32>
    %c0_22 = arith.constant 0 : index
    %c0_23 = arith.constant 0 : index
    %60 = vector.load %arg13[%c0_22, %c0_23] : memref<32x32xf32, #tpu.memory_space<vmem>>, vector<32x32xf32>
    %cst_24 = arith.constant dense<0.000000e+00> : vector<16x32xf32>
    %61 = tpu.matmul %59, %60, %cst_24 {dimension_numbers = #tpu.dot_dimension_numbers<[1], [0], [0], [1], [0, 0, 1, 1], [], []>} : vector<16x32xf32>, vector<32x32xf32>, vector<16x32xf32> -> vector<16x32xf32>
    %62 = tpu.reciprocal %61 {approx = true} : vector<16x32xf32> -> vector<16x32xf32>
    %63 = arith.mulf %59, %62 : vector<16x32xf32>
    %64 = vector.shape_cast %63 : vector<16x32xf32> to vector<2x8x32xf32>
    %65 = arith.truncf %64 : vector<2x8x32xf32> to vector<2x8x32xbf16>
    "tpu.trace_start"() <{level = 10 : i32, message = "bqt,btd->bqd"}> : () -> ()
    %cst_25 = arith.constant dense<0.000000e+00> : vector<2x8x32xf32>
    %66 = tpu.matmul %65, %50, %cst_25 {dimension_numbers = #tpu.dot_dimension_numbers<[2], [1], [1], [2], [0, 0, 0, 1, 1, 2], [0], [0]>} : vector<2x8x32xbf16>, vector<2x32x32xbf16>, vector<2x8x32xf32> -> vector<2x8x32xf32>
    "tpu.trace_stop"() : () -> ()
    %67 = vector.shape_cast %66 : vector<2x8x32xf32> to vector<16x32xf32>
    %68 = arith.truncf %67 : vector<16x32xf32> to vector<16x32xbf16>
    %c0_26 = arith.constant 0 : index
    %c0_27 = arith.constant 0 : index
    %69 = vector.load %arg6[%c0_26, %c0_27] : memref<32x32xbf16, #tpu.memory_space<vmem>>, vector<32x32xbf16>
    %cst_28 = arith.constant dense<0.000000e+00> : vector<16x32xf32>
    %70 = tpu.matmul %68, %69, %cst_28 {dimension_numbers = #tpu.dot_dimension_numbers<[1], [0], [0], [1], [0, 0, 1, 1], [], []>} : vector<16x32xbf16>, vector<32x32xbf16>, vector<16x32xf32> -> vector<16x32xf32>
    %71 = arith.addf %1, %70 : vector<16x32xf32>
    %72 = arith.mulf %71, %71 : vector<16x32xf32>
    %cst_29 = arith.constant dense<0.000000e+00> : vector<16xf32>
    %73 = vector.multi_reduction <add>, %72, %cst_29 [1] : vector<16x32xf32> to vector<16xf32>
    %74 = vector.shape_cast %73 : vector<16xf32> to vector<16x1xf32>
    %cst_30 = arith.constant 3.200000e+01 : f32
    %75 = vector.broadcast %cst_30 : f32 to vector<16x1xf32>
    %76 = arith.divf %74, %75 : vector<16x1xf32>
    %cst_31 = arith.constant 9.99999997E-7 : f32
    %77 = vector.broadcast %cst_31 : f32 to vector<16x1xf32>
    %78 = arith.addf %76, %77 : vector<16x1xf32>
    %79 = math.rsqrt %78 : vector<16x1xf32>
    %80 = vector.broadcast %79 : vector<16x1xf32> to vector<16x32xf32>
    %81 = arith.mulf %71, %80 : vector<16x32xf32>
    %c0_32 = arith.constant 0 : index
    %c0_33 = arith.constant 0 : index
    %82 = vector.load %arg10[%c0_32, %c0_33] : memref<1x32xf32, #tpu.memory_space<vmem>>, vector<1x32xf32>
    %83 = vector.broadcast %82 : vector<1x32xf32> to vector<16x32xf32>
    %84 = arith.mulf %81, %83 : vector<16x32xf32>
    %85 = arith.truncf %84 : vector<16x32xf32> to vector<16x32xbf16>
    %c0_34 = arith.constant 0 : index
    %c0_35 = arith.constant 0 : index
    %86 = vector.load %arg7[%c0_34, %c0_35] : memref<32x128xbf16, #tpu.memory_space<vmem>>, vector<32x128xbf16>
    %cst_36 = arith.constant dense<0.000000e+00> : vector<16x128xf32>
    %87 = tpu.matmul %85, %86, %cst_36 {dimension_numbers = #tpu.dot_dimension_numbers<[1], [0], [0], [1], [0, 0, 1, 1], [], []>} : vector<16x32xbf16>, vector<32x128xbf16>, vector<16x128xf32> -> vector<16x128xf32>
    %88 = vector.extract_strided_slice %87 {offsets = [0, 0], sizes = [16, 64], strides = [1, 1]} : vector<16x128xf32> to vector<16x64xf32>
    %89 = vector.extract_strided_slice %87 {offsets = [0, 64], sizes = [16, 64], strides = [1, 1]} : vector<16x128xf32> to vector<16x64xf32>
    %90 = arith.negf %88 : vector<16x64xf32>
    %91 = math.exp %90 : vector<16x64xf32>
    %cst_37 = arith.constant 1.000000e+00 : f32
    %92 = vector.broadcast %cst_37 : f32 to vector<16x64xf32>
    %93 = arith.addf %92, %91 : vector<16x64xf32>
    %94 = arith.divf %92, %93 : vector<16x64xf32>
    %95 = arith.mulf %88, %94 : vector<16x64xf32>
    %96 = arith.mulf %95, %89 : vector<16x64xf32>
    %97 = arith.truncf %96 : vector<16x64xf32> to vector<16x64xbf16>
    %c0_38 = arith.constant 0 : index
    %c0_39 = arith.constant 0 : index
    %98 = vector.load %arg8[%c0_38, %c0_39] : memref<64x32xbf16, #tpu.memory_space<vmem>>, vector<64x32xbf16>
    %cst_40 = arith.constant dense<0.000000e+00> : vector<16x32xf32>
    %99 = tpu.matmul %97, %98, %cst_40 {dimension_numbers = #tpu.dot_dimension_numbers<[1], [0], [0], [1], [0, 0, 1, 1], [], []>} : vector<16x64xbf16>, vector<64x32xbf16>, vector<16x32xf32> -> vector<16x32xf32>
    %100 = arith.addf %71, %99 : vector<16x32xf32>
    %101 = vector.shape_cast %100 : vector<16x32xf32> to vector<2x8x32xf32>
    %c0_41 = arith.constant 0 : index
    %c0_42 = arith.constant 0 : index
    %c0_43 = arith.constant 0 : index
    %102 = vector.load %arg14[%c0_41, %c0_42, %c0_43] : memref<2x8x32xf32, #tpu.memory_space<vmem>>, vector<2x8x32xf32>
    tpu.vector_store %arg14[%c0_41, %c0_42, %c0_43], %101 {strides = array<i32>} : memref<2x8x32xf32, #tpu.memory_space<vmem>>, vector<2x8x32xf32>,
    return
  }
  func.func @transform_0(%arg0: i32) -> (i32, i32, i32) {
    %c0_i32 = arith.constant 0 : i32
    %c0_i32_0 = arith.constant 0 : i32
    %c0_i32_1 = arith.constant 0 : i32
    %c0_i32_2 = arith.constant 0 : i32
    return %c0_i32, %c0_i32_0, %c0_i32_1 : i32, i32, i32
  }
  func.func @transform_1(%arg0: i32) -> (i32, i32, i32) {
    %c0_i32 = arith.constant 0 : i32
    %c0_i32_0 = arith.constant 0 : i32
    %c0_i32_1 = arith.constant 0 : i32
    %c0_i32_2 = arith.constant 0 : i32
    return %c0_i32, %c0_i32_0, %c0_i32_1 : i32, i32, i32
  }
  func.func @transform_2(%arg0: i32) -> (i32, i32) {
    %c0_i32 = arith.constant 0 : i32
    %c0_i32_0 = arith.constant 0 : i32
    %c0_i32_1 = arith.constant 0 : i32
    return %c0_i32, %c0_i32_0 : i32, i32
  }
  func.func @transform_3(%arg0: i32) -> (i32, i32) {
    %c0_i32 = arith.constant 0 : i32
    %c0_i32_0 = arith.constant 0 : i32
    %c0_i32_1 = arith.constant 0 : i32
    return %c0_i32, %c0_i32_0 : i32, i32
  }
  func.func @transform_4(%arg0: i32) -> (i32, i32) {
    %c0_i32 = arith.constant 0 : i32
    %c0_i32_0 = arith.constant 0 : i32
    %c0_i32_1 = arith.constant 0 : i32
    return %c0_i32, %c0_i32_0 : i32, i32
  }
  func.func @transform_5(%arg0: i32) -> (i32, i32) {
    %c0_i32 = arith.constant 0 : i32
    %c0_i32_0 = arith.constant 0 : i32
    %c0_i32_1 = arith.constant 0 : i32
    return %c0_i32, %c0_i32_0 : i32, i32
  }
  func.func @transform_6(%arg0: i32) -> (i32, i32) {
    %c0_i32 = arith.constant 0 : i32
    %c0_i32_0 = arith.constant 0 : i32
    %c0_i32_1 = arith.constant 0 : i32
    return %c0_i32, %c0_i32_0 : i32, i32
  }
  func.func @transform_7(%arg0: i32) -> (i32, i32) {
    %c0_i32 = arith.constant 0 : i32
    %c0_i32_0 = arith.constant 0 : i32
    %c0_i32_1 = arith.constant 0 : i32
    return %c0_i32, %c0_i32_0 : i32, i32
  }
  func.func @transform_8(%arg0: i32) -> (i32, i32) {
    %c0_i32 = arith.constant 0 : i32
    %c0_i32_0 = arith.constant 0 : i32
    %c0_i32_1 = arith.constant 0 : i32
    return %c0_i32, %c0_i32_0 : i32, i32
  }
  func.func @transform_9(%arg0: i32) -> (i32, i32) {
    %c0_i32 = arith.constant 0 : i32
    %c0_i32_0 = arith.constant 0 : i32
    %c0_i32_1 = arith.constant 0 : i32
    return %c0_i32, %c0_i32_0 : i32, i32
  }
  func.func @transform_10(%arg0: i32) -> (i32, i32) {
    %c0_i32 = arith.constant 0 : i32
    %c0_i32_0 = arith.constant 0 : i32
    %c0_i32_1 = arith.constant 0 : i32
    return %c0_i32, %c0_i32_0 : i32, i32
  }
  func.func @transform_11(%arg0: i32) -> (i32, i32) {
    %c0_i32 = arith.constant 0 : i32
    %c0_i32_0 = arith.constant 0 : i32
    %c0_i32_1 = arith.constant 0 : i32
    return %c0_i32, %c0_i32_0 : i32, i32
  }
  func.func @transform_12(%arg0: i32) -> (i32, i32) {
    %c0_i32 = arith.constant 0 : i32
    %c0_i32_0 = arith.constant 0 : i32
    %c0_i32_1 = arith.constant 0 : i32
    return %c0_i32, %c0_i32_0 : i32, i32
  }
  func.func @transform_13(%arg0: i32) -> (i32, i32, i32) {
    %c0_i32 = arith.constant 0 : i32
    %c0_i32_0 = arith.constant 0 : i32
    %c0_i32_1 = arith.constant 0 : i32
    %c0_i32_2 = arith.constant 0 : i32
    return %c0_i32, %c0_i32_0, %c0_i32_1 : i32, i32, i32
  }
}

</mosaic_0001>

<bundles_post_ra>
// kernel: tpu_custom_call.1
= control target key start
LH: loop header
LB: loop body
LE: loop exit
PB: predicated region body
PF: predicated region fallthrough
CT: control target
= control target key end

     0   :  { %18 = vsyncpa [#allocation3], 0  ;;  %s1721_s0 = inlined_call_operand.hbm [shape: f32[2,8,32], index: 0, kind: input, shape index: {}]   ;;  %s1722_s1 = inlined_call_operand.hbm [shape: f32[2,8,32], index: 1, kind: input, shape index: {}]   ;;  %s1723_s2 = inlined_call_operand.hbm [shape: f32[16,32], index: 2, kind: input, shape index: {}]   ;;  %s1724_s3 = inlined_call_operand.hbm [shape: f32[16,32], index: 3, kind: input, shape index: {}]   ;;  %s1725_s4 = inlined_call_operand.hbm [shape: bf16[32,96], index: 4, kind: input, shape index: {}]   ;;  %s1726_s5 = inlined_call_operand.hbm [shape: bf16[32,32], index: 5, kind: input, shape index: {}]   ;;  %s1727_s6 = inlined_call_operand.hbm [shape: bf16[32,128], index: 6, kind: input, shape index: {}]   ;;  %s1728_s7 = inlined_call_operand.vmem [shape: bf16[64,32], index: 7, kind: input, shape index: {}]   ;;  %s1729_s8 = inlined_call_operand.hbm [shape: f32[1,32], index: 8, kind: input, shape index: {}]   ;;  %s1730_s9 = inlined_call_operand.hbm [shape: f32[1,32], index: 9, kind: input, shape index: {}]   ;;  %s1731_s10 = inlined_call_operand.vmem [shape: f32[32,32], index: 10, kind: input, shape index: {}]   ;;  %s1732_s11 = inlined_call_operand.vmem [shape: f32[32,32], index: 11, kind: input, shape index: {}]   ;;  %s1733_s12 = inlined_call_operand.hbm [shape: f32[32,32], index: 12, kind: input, shape index: {}]   ;;  %s1734_s13 = inlined_call_operand.hbm [shape: f32[2,8,32], index: 13, kind: output, shape index: {}]  }
   0x1   :  { %19 = vsyncpa [#allocation6], 0 }
   0x2   :  { %20 = vsyncpa [#allocation9], 0 }
   0x3   :  { %21 = vsyncpa [#allocation12], 0 }
   0x4   :  { %22 = vsyncpa [#allocation15], 0 }
   0x5   :  { %23 = vsyncpa [#allocation18], 0 }
   0x6   :  { %24 = vsyncpa [#allocation4], 0  ;;  %s1410_s25 = smov [#allocation5]   ;;  %s1411_s27 = smov [#allocation8]  }
   0x7   :  { %s42_s26 = sshll.u32 %s1410_s25, 4  ;;  %s66_s28 = sshll.u32 %s1411_s27, 4  ;;  %s43_s26 = int_to_ptr.vmem [resolvable:$true] %s42_s26  ;;  %s67_s28 = int_to_ptr.vmem [resolvable:$true] %s66_s28 }
   0x8   :  { %s1184_s29 = scalar_lea.vmem %s43_s26, 256  ;;  %p1189_p1 = scmp.lt.s32.totalorder %s43_s26, %s43_s26 }
   0x9   :  { %p1185_p0 = scmp.ne.s32.totalorder %s43_s26, %s1184_s29  ;;  %p1190_p2 = scmp.lt.s32.totalorder %s1184_s29, %s1184_s29 }
   0xb   :  { %p1191_p3 = por %p1190_p2, %p1189_p1 }
   0xd   :  { %p1192_p4 = pnand %p1191_p3, %p1185_p0 }
   0xf   :  { %1195 = shalt.err (!%p1192_p4)
}
  0x10   :  { %s1412_s30 = smov 128   ;;  %s1413_s14 = smov 8  }
  0x11   :  { %48 = dma.hbm_to_vmem [thread:$0]  %s1722_s1, 256, %s43_s26, [#allocation6], %s1412_s30, %s1412_s30, %s1413_s14  }
  0x12   :  { %s1204_s17 = scalar_lea.vmem %s67_s28, 256  ;;  %p1209_p6 = scmp.lt.s32.totalorder %s67_s28, %s67_s28 }
  0x13   :  { %p1205_p5 = scmp.ne.s32.totalorder %s67_s28, %s1204_s17  ;;  %p1210_p7 = scmp.lt.s32.totalorder %s1204_s17, %s1204_s17 }
  0x15   :  { %p1211_p8 = por %p1210_p7, %p1209_p6 }
  0x17   :  { %p1212_p9 = pnand %p1211_p8, %p1205_p5 }
  0x19   :  { %1215 = shalt.err (!%p1212_p9)
}
  0x1a   :  { %72 = dma.hbm_to_vmem [thread:$0]  %s1724_s3, 256, %s67_s28, [#allocation9], %s1412_s30, %s1412_s30, %s1413_s14  }
  0x1b   :  { %s1414_s20 = smov [#allocation11]   ;;  %s1415_s22 = smov [#allocation14]  }
  0x1c   :  { %s90_s21 = sshll.u32 %s1414_s20, 4  ;;  %s117_s23 = sshll.u32 %s1415_s22, 4  ;;  %s91_s21 = int_to_ptr.vmem [resolvable:$true] %s90_s21  ;;  %s118_s23 = int_to_ptr.vmem [resolvable:$true] %s117_s23 }
  0x1d   :  { %s1224_s1 = scalar_lea.vmem %s91_s21, 256  ;;  %p1229_p11 = scmp.lt.s32.totalorder %s91_s21, %s91_s21 }
  0x1e   :  { %p1225_p10 = scmp.ne.s32.totalorder %s91_s21, %s1224_s1  ;;  %p1230_p12 = scmp.lt.s32.totalorder %s1224_s1, %s1224_s1 }
  0x20   :  { %p1231_p13 = por %p1230_p12, %p1229_p11 }
  0x22   :  { %p1232_p0 = pnand %p1231_p13, %p1225_p10 }
  0x24   :  { %1235 = shalt.err (!%p1232_p0)
}
  0x25   :  { %s1416_s24 = smov 64   ;;  %s1417_s25 = smov 4  }
  0x26   :  { %96 = dma.hbm_to_vmem [thread:$0]  %s1726_s5, 256, %s91_s21, [#allocation12], %s1416_s24, %s1416_s24, %s1417_s25  }
  0x27   :  { %s1244_s27 = scalar_lea.vmem %s118_s23, 16  ;;  %s1248_s28 = scalar_lea.vmem %s118_s23, 32 }
  0x28   :  { %p1245_p1 = scmp.ne.s32.totalorder %s118_s23, %s1244_s27  ;;  %p1249_p2 = scmp.lt.s32.totalorder %s118_s23, %s118_s23 }
  0x29   :  { %p1250_p3 = scmp.lt.s32.totalorder %s1248_s28, %s1244_s27 }
  0x2b   :  { %p1251_p4 = por %p1250_p3, %p1249_p2 }
  0x2d   :  { %p1252_p5 = pnand %p1251_p4, %p1245_p1 }
  0x2f   :  { %1255 = shalt.err (!%p1252_p5)
}
  0x30   :  { %120 = dma.hbm_to_vmem [thread:$0]  %s1729_s8, 16, %s118_s23, [#allocation15]  }
  0x31   :  { %s1418_s16 = smov [#allocation2]   ;;  %s1419_s18 = smov [#allocation7]  }
  0x32   :  { %s30_s17 = sshll.u32 %s1418_s16, 4  ;;  %s54_s19 = sshll.u32 %s1419_s18, 4  ;;  %s31_s17 = int_to_ptr.vmem [resolvable:$true] %s30_s17  ;;  %s55_s19 = int_to_ptr.vmem [resolvable:$true] %s54_s19 }
  0x33   :  { %s1264_s20 = scalar_lea.vmem %s31_s17, 256  ;;  %p1269_p7 = scmp.lt.s32.totalorder %s31_s17, %s31_s17 }
  0x34   :  { %p1265_p6 = scmp.ne.s32.totalorder %s31_s17, %s1264_s20  ;;  %p1270_p8 = scmp.lt.s32.totalorder %s1264_s20, %s1264_s20 }
  0x36   :  { %p1271_p9 = por %p1270_p8, %p1269_p7 }
  0x38   :  { %p1272_p10 = pnand %p1271_p9, %p1265_p6 }
  0x3a   :  { %1275 = shalt.err (!%p1272_p10)
}
  0x3b   :  { %36 = dma.hbm_to_vmem [thread:$0]  %s1721_s0, 256, %s31_s17, [#allocation3], %s1412_s30, %s1412_s30, %s1413_s14  }
  0x3c   :  { %s1284_s8 = scalar_lea.vmem %s55_s19, 256  ;;  %p1289_p12 = scmp.lt.s32.totalorder %s55_s19, %s55_s19 }
  0x3d   :  { %p1285_p11 = scmp.ne.s32.totalorder %s55_s19, %s1284_s8  ;;  %p1290_p13 = scmp.lt.s32.totalorder %s1284_s8, %s1284_s8 }
  0x3f   :  { %p1291_p0 = por %p1290_p13, %p1289_p12 }
  0x41   :  { %p1292_p1 = pnand %p1291_p0, %p1285_p11 }
  0x43   :  { %1295 = shalt.err (!%p1292_p1)
}
  0x44   :  { %60 = dma.hbm_to_vmem [thread:$0]  %s1723_s2, 256, %s55_s19, [#allocation6], %s1412_s30, %s1412_s30, %s1413_s14  }
  0x45   :  { %s1420_s1 = smov [#allocation10]   ;;  %s1421_s3 = smov [#allocation13]  }
  0x46   :  { %s78_s26 = sshll.u32 %s1420_s1, 4  ;;  %s102_s27 = sshll.u32 %s1421_s3, 4  ;;  %s79_s26 = int_to_ptr.vmem [resolvable:$true] %s78_s26  ;;  %s103_s27 = int_to_ptr.vmem [resolvable:$true] %s102_s27 }
  0x47   :  { %s1304_s0 = scalar_lea.vmem %s79_s26, 256  ;;  %p1309_p3 = scmp.lt.s32.totalorder %s79_s26, %s79_s26 }
  0x48   :  { %p1305_p2 = scmp.ne.s32.totalorder %s79_s26, %s1304_s0  ;;  %p1310_p4 = scmp.lt.s32.totalorder %s1304_s0, %s1304_s0 }
  0x4a   :  { %p1311_p5 = por %p1310_p4, %p1309_p3 }
  0x4c   :  { %p1312_p6 = pnand %p1311_p5, %p1305_p2 }
  0x4e   :  { %1315 = shalt.err (!%p1312_p6)
}
  0x4f   :  { %84 = dma.hbm_to_vmem [thread:$0]  %s1725_s4, 256, %s79_s26, [#allocation9], %s1416_s24, %s1416_s24, %s1417_s25  }
  0x50   :  { %s1324_s2 = scalar_lea.vmem %s103_s27, 256  ;;  %p1329_p8 = scmp.lt.s32.totalorder %s103_s27, %s103_s27 }
  0x51   :  { %p1325_p7 = scmp.ne.s32.totalorder %s103_s27, %s1324_s2  ;;  %p1330_p9 = scmp.lt.s32.totalorder %s1324_s2, %s1324_s2 }
  0x53   :  { %p1331_p10 = por %p1330_p9, %p1329_p8 }
  0x55   :  { %p1332_p11 = pnand %p1331_p10, %p1325_p7 }
  0x57   :  { %1335 = shalt.err (!%p1332_p11)
}
  0x58   :  { %108 = dma.hbm_to_vmem [thread:$0]  %s1727_s6, 256, %s103_s27, [#allocation12], %s1416_s24, %s1416_s24, %s1417_s25  }
  0x59   :  { %s1422_s17 = smov [#allocation16]   ;;  %s1423_s19 = smov [#allocation17]  }
  0x5a   :  { %s127_s18 = sshll.u32 %s1422_s17, 4  ;;  %s140_s20 = sshll.u32 %s1423_s19, 4  ;;  %s128_s18 = int_to_ptr.vmem [resolvable:$true] %s127_s18  ;;  %s141_s20 = int_to_ptr.vmem [resolvable:$true] %s140_s20 }
  0x5b   :  { %s1344_s4 = scalar_lea.vmem %s128_s18, 16  ;;  %s1348_s5 = scalar_lea.vmem %s128_s18, 32 }
  0x5c   :  { %p1345_p12 = scmp.ne.s32.totalorder %s128_s18, %s1344_s4  ;;  %p1349_p13 = scmp.lt.s32.totalorder %s128_s18, %s128_s18 }
  0x5d   :  { %p1350_p0 = scmp.lt.s32.totalorder %s1348_s5, %s1344_s4 }
  0x5f   :  { %p1351_p1 = por %p1350_p0, %p1349_p13 }
  0x61   :  { %p1352_p2 = pnand %p1351_p1, %p1345_p12 }
  0x63   :  { %1355 = shalt.err (!%p1352_p2)
}
  0x64   :  { %130 = dma.hbm_to_vmem [thread:$0]  %s1730_s9, 16, %s128_s18, [#allocation15]  }
  0x65   :  { %s1364_s22 = scalar_lea.vmem %s141_s20, 512  ;;  %p1369_p4 = scmp.lt.s32.totalorder %s141_s20, %s141_s20 }
  0x66   :  { %p1365_p3 = scmp.ne.s32.totalorder %s141_s20, %s1364_s22  ;;  %p1370_p5 = scmp.lt.s32.totalorder %s1364_s22, %s1364_s22 }
  0x68   :  { %p1371_p6 = por %p1370_p5, %p1369_p4 }
  0x6a   :  { %p1372_p7 = pnand %p1371_p6, %p1365_p3 }
  0x6c   :  { %1375 = shalt.err (!%p1372_p7)
}
  0x6d   :  { %146 = dma.hbm_to_vmem [thread:$0]  %s1733_s12, 512, %s141_s20, [#allocation18], %s1412_s30, %s1412_s30, %s1413_s14  }
  0x6e   :  { %1396 = dma.done.wait [#allocation3], 256  }
  0x6f   :  { %1397 = vsyncadd [#allocation3], 4294967040 }
  0x70   :  { %1398 = dma.done.wait [#allocation6], 512  }
  0x71   :  { %1399 = vsyncadd [#allocation6], 4294966784 }
  0x72   :  { %1400 = dma.done.wait [#allocation9], 512  }
  0x73   :  { %1401 = vsyncadd [#allocation9], 4294966784 }
  0x74   :  { %1402 = dma.done.wait [#allocation12], 512  }
  0x75   :  { %1403 = vsyncadd [#allocation12], 4294966784 }
  0x76   :  { %1404 = dma.done.wait [#allocation15], 32  }
  0x77   :  { %1405 = vsyncadd [#allocation15], 4294967264 }
  0x78   :  { %1406 = dma.done.wait [#allocation18], 512  }
  0x79   :  { %1407 = vsyncadd [#allocation18], 4294966784  ;;  %v1556_v0 = vld [vmem:[#allocation2] sm:$0xff]  ;;  %vm182_vm0 = vcmask 261120   ;;  %v1558_v1 = vld [vmem:[#allocation2 + $0x8] sm:$0xff]  ;;  %v1424_v7 = vmov 0.0  }
  0x7a   :  { %v180_v2 = vmul.f32 %v1556_v0, %v1556_v0  ;;  %v181_v3 = vmul.f32 %v1558_v1, %v1558_v1  ;;  %v1142_v6 = vld [vmem:[#allocation10 + $0x8] sm:$0xff]   ;;  %1041 = vmatprep.subr.bf16.mxu1 %v1424_v7  ;;  %vm1425_vm1 = vmmov 0   ;;  %v1143_v8 = vld [vmem:[#allocation10] sm:$0xff]   ;;  %1057 = vmatprep.subr.bf16.mxu0 %v1424_v7  ;;  %v985_v18 = vld [vmem:[#allocation14] ss:$0 sm:$0xff]  ;;  %s1426_s9 = smov 112  }
  0x7b   :  { %1045 = vmatprep.mubr.msk.bf16.mxu1 %vm1425_vm1, %v1424_v7  ;;  %1042 = vmatpush3.bf16.msra.mxu1 %v1142_v6  ;;  %s1427_s12 = smov 80   ;;  %v330_v27 = vld [vmem:[%s1731_s10 + $0x18] sm:$0xff]  ;;  %s1428_s26 = smov 32   ;;  %v328_v28 = vld [vmem:[%s1731_s10 + $0x8] sm:$0xff]  ;;  %v1593_v29 = vld [vmem:[#allocation7] sm:$0xff]  ;;  %vm288_vm2 = vcmask 130048  }
  0x7c   :  { %v183_v4 = vsel %vm182_vm0, %v180_v2, 0.0  ;;  %v186_v5 = vsel %vm182_vm0, %v181_v3, 0.0  ;;  %1043 = vmatprep.subr.bf16.mxu1 %v1424_v7  ;;  %1061 = vmatprep.mubr.msk.bf16.mxu0 %vm1425_vm1, %v1424_v7  ;;  %v1596_v30 = vld [vmem:[#allocation7 + $0x8] sm:$0xff]  ;;  %v270_v32 = vld [vmem:[#allocation8] sm:$0xff]  ;;  %v271_v36 = vld [vmem:[#allocation8 + $0x8] sm:$0xff]  ;;  %s1430_s15 = smov 16  }
  0x7d   :  { %184 = vadd.xlane.f32.xlu0 %v183_v4  ;;  %v329_v41 = vld [vmem:[%s1731_s10 + $0x10] sm:$0xff]  ;;  %v327_v42 = vld [vmem:[%s1731_s10] sm:$0xff]  ;;  %s1429_s10 = smov 96   ;;  %vm914_vm3 = vcmask 523264  }
  0x7f   :  { %1044 = vmatpush3.bf16.msra.mxu1 %v1143_v8 }
  0x80   :  { %1049 = vmatprep.subr.bf16.mxu1 %v1424_v7 }
  0x81   :  { %187 = vadd.xlane.f32.xlu0 %v186_v5 }
 0x106   :  { %v185_v9 = vpop.xlane.xlu0 %184 }
 0x107   :  { %v190_v10 = vmul.f32 0.03125, %v185_v9 }
 0x109   :  { %v192_v11 = vadd.f32 1e-06, %v190_v10 }
 0x10a   :  { %v188_v12 = vpop.xlane.xlu0 %187 }
 0x10b   :  { %1152 = vrsqrt.f32 %v192_v11  ;;  %v191_v13 = vmul.f32 0.03125, %v188_v12 }
 0x10d   :  { %v193_v14 = vadd.f32 1e-06, %v191_v13 }
 0x10f   :  { %1154 = vrsqrt.f32 %v193_v14 }
 0x118   :  { %v1153_v15 = vpop.eup %1152 }
 0x119   :  { %v196_v16 = vmul.f32 %v1153_v15, %v1556_v0 }
 0x11b   :  { %v205_v20 = vmul.f32 %v985_v18, %v196_v16 }
 0x11c   :  { %v1155_v17 = vpop.eup %1154 }
 0x11d   :  { %v197_v19 = vmul.f32 %v1155_v17, %v1558_v1 }
 0x11f   :  { %v206_v21 = vmul.f32 %v985_v18, %v197_v19 }
 0x121   :  { %v207_v22 = vpack.c.bf16 %v206_v21, %v205_v20 }
 0x123   :  { %1046 = vmatmul.mubr.msk.bf16.vlgmr.msra.gmra.mxu1 %vm182_vm0, %v207_v22 }
 0x124   :  { %1053 = vmatprep.mubr.msk.bf16.mxu1 %vm1425_vm1, %v1424_v7 }
 0x1e3   :  { %v1579_v23 = vpop.f32.mrf.mxu1 }
 0x1e4   :  { %276 = vrot.lane.b32.xlu1 %v1579_v23, %s1426_s9  ;;  %v272_v16 = vmul.f32 %v1593_v29, %v1579_v23 }
 0x1e5   :  { %v1047_v24 = vpop.f32.mrf.mxu1 }
 0x1e7   :  { %v1582_v25 = vpop.f32.mrf.mxu1 }
 0x1e8   :  { %305 = vrot.lane.b32.xlu1 %v1579_v23, %s1427_s12  ;;  %278 = vrot.lane.b32.xlu0 %v1582_v25, %s1426_s9  ;;  %v273_v20 = vmul.f32 %v1596_v30, %v1582_v25 }
 0x1e9   :  { %v1048_v26 = vpop.f32.mrf.mxu1 }
 0x1ec   :  { %307 = vrot.lane.b32.xlu1 %v1582_v25, %s1427_s12  ;;  %341 = vrot.lane.b32.xlu0 %v330_v27, %s1428_s26 }
 0x1f0   :  { %297 = vrot.lane.b32.xlu1 %v1593_v29, %s1428_s26  ;;  %337 = vrot.lane.b32.xlu0 %v328_v28, %s1428_s26  ;;  %v391_v28 = vld [vmem:[#allocation5] sm:$0xff]  ;;  %v392_v29 = vld [vmem:[#allocation5 + $0x8] sm:$0xff] }
 0x1f4   :  { %299 = vrot.lane.b32.xlu1 %v1596_v30, %s1428_s26 }
 0x256   :  { %v277_v31 = vpop.permute.xlu1 %276 }
 0x25a   :  { %v306_v33 = vpop.permute.xlu1 %305  ;;  %v279_v37 = vpop.permute.xlu0 %278 }
 0x25b   :  { %v311_v34 = vsel %vm288_vm2, %v306_v33, %v277_v31 }
 0x25c   :  { %v313_v35 = vmul.f32 %v311_v34, %v270_v32 }
 0x25e   :  { %317 = vrot.lane.b32.xlu1 %v313_v35, %s1428_s26  ;;  %v308_v38 = vpop.permute.xlu1 %307  ;;  %v342_v48 = vpop.permute.xlu0 %341 }
 0x25f   :  { %v312_v39 = vsel %vm288_vm2, %v308_v38, %v279_v37 }
 0x260   :  { %v314_v40 = vmul.f32 %v312_v39, %v271_v36 }
 0x262   :  { %319 = vrot.lane.b32.xlu1 %v314_v40, %s1428_s26  ;;  %v298_v43 = vpop.permute.xlu1 %297  ;;  %v338_v57 = vpop.permute.xlu0 %337 }
 0x263   :  { %v303_v46 = vmul.f32 %v298_v43, %v1579_v23  ;;  %v359_v43 = vld [vmem:[%s1732_s11] sm:$0xff] }
 0x266   :  { %339 = vrot.lane.b32.xlu1 %v329_v41, %s1428_s26  ;;  %v300_v44 = vpop.permute.xlu1 %299 }
 0x267   :  { %v304_v47 = vmul.f32 %v300_v44, %v1582_v25  ;;  %v361_v44 = vld [vmem:[%s1732_s11 + $0x10] sm:$0xff] }
 0x26a   :  { %335 = vrot.lane.b32.xlu1 %v327_v42, %s1428_s26  ;;  %v362_v42 = vld [vmem:[%s1732_s11 + $0x18] sm:$0xff] }
 0x2d0   :  { %v318_v45 = vpop.permute.xlu1 %317 }
 0x2d1   :  { %v323_v50 = vadd.f32 %v318_v45, %v303_v46  ;;  %v518_v45 = vld [vmem:[#allocation17 + $0x18] sm:$0xff]  ;;  %v517_v46 = vld [vmem:[#allocation17 + $0x10] sm:$0xff] }
 0x2d3   :  { %v350_v54 = vmul.f32 %v342_v48, %v323_v50  ;;  %v348_v61 = vmul.f32 %v338_v57, %v323_v50 }
 0x2d4   :  { %v320_v49 = vpop.permute.xlu1 %319 }
 0x2d5   :  { %v324_v51 = vadd.f32 %v320_v49, %v304_v47  ;;  %v360_v47 = vld [vmem:[%s1732_s11 + $0x8] sm:$0xff]  ;;  %v515_v49 = vld [vmem:[#allocation17] sm:$0xff] }
 0x2d7   :  { %v354_v56 = vmul.f32 %v342_v48, %v324_v51  ;;  %v352_v3 = vmul.f32 %v338_v57, %v324_v51  ;;  %v516_v48 = vld [vmem:[#allocation17 + $0x8] sm:$0xff] }
 0x2d8   :  { %v340_v52 = vpop.permute.xlu1 %339 }
 0x2d9   :  { %v349_v53 = vmul.f32 %v340_v52, %v323_v50  ;;  %v353_v55 = vmul.f32 %v340_v52, %v324_v51 }
 0x2db   :  { %v356_v58 = vpack.c.bf16 %v350_v54, %v349_v53  ;;  %v358_v59 = vpack.c.bf16 %v354_v56, %v353_v55 }
 0x2dc   :  { %v336_v60 = vpop.permute.xlu1 %335 }
 0x2dd   :  { %v347_v62 = vmul.f32 %v336_v60, %v323_v50  ;;  %452 = vrot.lane.b32.xlu0 %v358_v59, %s1429_s10  ;;  %397 = vrot.lane.b32.xlu1 %v356_v58, %s1429_s10  ;;  %v351_v63 = vmul.f32 %v336_v60, %v324_v51 }
 0x2df   :  { %v355_v2 = vpack.c.bf16 %v348_v61, %v347_v62  ;;  %v357_v4 = vpack.c.bf16 %v352_v3, %v351_v63 }
 0x2e1   :  { %282 = vrot.lane.b32.xlu0 %v1579_v23, %s1430_s15  ;;  %395 = vrot.lane.b32.xlu1 %v355_v2, %s1429_s10 }
 0x2e5   :  { %284 = vrot.lane.b32.xlu0 %v1582_v25, %s1430_s15  ;;  %450 = vrot.lane.b32.xlu1 %v357_v4, %s1429_s10 }
 0x34f   :  { %v398_v5 = vpop.permute.xlu1 %397  ;;  %v453_v6 = vpop.permute.xlu0 %452 }
 0x350   :  { %v406_v8 = vsel %vm182_vm0, %v398_v5, 0  ;;  %v461_v9 = vsel %vm182_vm0, %v453_v6, 0 }
 0x351   :  { %1050 = vmatpush3.bf16.xpose.msra.mxu1 %v406_v8  ;;  %1058 = vmatpush3.bf16.xpose.msra.mxu0 %v461_v9 }
 0x352   :  { %1051 = vmatprep.subr.bf16.mxu1 %v1424_v7  ;;  %1059 = vmatprep.subr.bf16.mxu0 %v1424_v7 }
 0x353   :  { %v396_v10 = vpop.permute.xlu1 %395  ;;  %v283_v11 = vpop.permute.xlu0 %282 }
 0x354   :  { %v289_v12 = vsel %vm288_vm2, %v277_v31, %v283_v11  ;;  %v403_v17 = vsel %vm182_vm0, %v396_v10, 0 }
 0x355   :  { %v291_v13 = vmul.f32 %v289_v12, %v270_v32 }
 0x357   :  { %v451_v14 = vpop.permute.xlu1 %450  ;;  %v285_v15 = vpop.permute.xlu0 %284  ;;  %v293_v22 = vadd.f32 %v291_v13, %v272_v16 }
 0x358   :  { %v458_v18 = vsel %vm182_vm0, %v451_v14, 0  ;;  %v290_v19 = vsel %vm288_vm2, %v279_v37, %v285_v15 }
 0x359   :  { %v292_v21 = vmul.f32 %v290_v19, %v271_v36  ;;  %1052 = vmatpush3.bf16.xpose.msra.mxu1 %v403_v17  ;;  %1060 = vmatpush3.bf16.xpose.msra.mxu0 %v458_v18  ;;  %v325_v27 = vpack.c.bf16 %v293_v22, %v293_v22  ;;  %v1144_v22 = vld [vmem:[#allocation11 + $0x8] sm:$0xff]  }
 0x35a   :  { %1076 = vmatprep.subr.bf16.mxu0 %v1424_v7  ;;  %1065 = vmatprep.subr.mxu1 %v518_v45 }
 0x35b   :  { %v294_v24 = vadd.f32 %v292_v21, %v273_v20 }
 0x35d   :  { %v326_v26 = vpack.c.bf16 %v294_v24, %v294_v24 }
 0x360   :  { %1054 = vmatmul.mubr.msk.bf16.vlgmr.msra.gmra.mxu1 %vm182_vm0, %v325_v27  ;;  %1062 = vmatmul.mubr.msk.bf16.vlgmr.msra.gmra.mxu0 %vm182_vm0, %v326_v26  ;;  %v1145_v26 = vld [vmem:[#allocation11] sm:$0xff]  }
 0x361   :  { %1080 = vmatprep.mubr.msk.bf16.mxu0 %vm1425_vm1, %v1424_v7  ;;  %1066 = vmatpush3.msra.mxu1 %v518_v45 }
 0x362   :  { %1067 = vmatprep.subr.mxu1 %v517_v46 }
 0x363   :  { %1068 = vmatpush3.msra.mxu1 %v517_v46  ;;  %v1147_v46 = vld [vmem:[#allocation13] sm:$0xff]  }
 0x364   :  { %1069 = vmatprep.subr.mxu1 %v516_v48 }
 0x365   :  { %1070 = vmatpush3.msra.mxu1 %v516_v48 }
 0x366   :  { %1071 = vmatprep.subr.mxu1 %v515_v49 }
 0x367   :  { %1072 = vmatpush3.msra.mxu1 %v515_v49 }
 0x368   :  { %1084 = vmatprep.subr.bf16.mxu1 %v1424_v7 }
 0x420   :  { %v442_v31 = vpop.f32.mrf.mxu1  ;;  %v497_v30 = vpop.f32.mrf.mxu0 }
 0x421   :  { %v443_v32 = vadd.f32 %v442_v31, %v391_v28  ;;  %v498_v33 = vadd.f32 %v497_v30, %v392_v29 }
 0x422   :  { %v1055_v34 = vpop.f32.mrf.mxu1  ;;  %v1063_v35 = vpop.f32.mrf.mxu0 }
 0x423   :  { %v506_v36 = vsel %vm182_vm0, %v498_v33, -inf  ;;  %v503_v37 = vsel %vm182_vm0, %v443_v32, -inf }
 0x424   :  { %507 = vmax.xlane.f32.xlu0 %v506_v36  ;;  %v500_v38 = vpop.f32.mrf.mxu0  ;;  %504 = vmax.xlane.f32.xlu1 %v503_v37  ;;  %v445_v39 = vpop.f32.mrf.mxu1 }
 0x426   :  { %v1056_v40 = vpop.f32.mrf.mxu1  ;;  %v1064_v41 = vpop.f32.mrf.mxu0 }
 0x435   :  { %373 = vrot.lane.b32.xlu1 %v362_v42, %s1416_s24 }
 0x439   :  { %367 = vrot.lane.b32.xlu1 %v359_v43, %s1416_s24 }
 0x43a   :  { %371 = vrot.lane.b32.xlu0 %v361_v44, %s1416_s24 }
 0x43e   :  { %369 = vrot.lane.b32.xlu0 %v360_v47, %s1416_s24 }
 0x4ad   :  { %v508_v50 = vpop.xlane.xlu0 %507  ;;  %v505_v51 = vpop.xlane.xlu1 %504 }
 0x4ae   :  { %v510_v52 = vsub.f32 %v498_v33, %v508_v50  ;;  %v509_v53 = vsub.f32 %v443_v32, %v505_v51 }
 0x4b0   :  { %v513_v54 = vmul.f32 1.442695, %v510_v52  ;;  %v511_v55 = vmul.f32 1.442695, %v509_v53 }
 0x4b1   :  { %v372_v56 = vpop.permute.xlu0 %371  ;;  %v374_v57 = vpop.permute.xlu1 %373 }
 0x4b2   :  { %1156 = vpow2.f32 %v513_v54  ;;  %v381_v58 = vmul.f32 %v372_v56, %v1579_v23  ;;  %v385_v59 = vmul.f32 %v372_v56, %v1582_v25  ;;  %v382_v60 = vmul.f32 %v374_v57, %v1579_v23 }
 0x4b3   :  { %1158 = vpow2.f32 %v511_v55  ;;  %v386_v61 = vmul.f32 %v374_v57, %v1582_v25  ;;  %v998_v55 = vld [vmem:[#allocation16] ss:$0 sm:$0xff] }
 0x4b4   :  { %v388_v62 = vpack.c.bf16 %v382_v60, %v381_v58  ;;  %v1148_v60 = vld [vmem:[%s1728_s7 + $0x18] sm:$0xff]  }
 0x4b5   :  { %v370_v63 = vpop.permute.xlu0 %369  ;;  %v368_v2 = vpop.permute.xlu1 %367  ;;  %v390_v3 = vpack.c.bf16 %v386_v61, %v385_v59  ;;  %v1149_v61 = vld [vmem:[%s1728_s7 + $0x10] sm:$0xff]  }
 0x4b6   :  { %v380_v4 = vmul.f32 %v370_v63, %v1579_v23  ;;  %v384_v5 = vmul.f32 %v370_v63, %v1582_v25  ;;  %v379_v6 = vmul.f32 %v368_v2, %v1579_v23  ;;  %v383_v8 = vmul.f32 %v368_v2, %v1582_v25  ;;  %610 = vrot.lane.b32.xlu1 %v388_v62, %s1416_s24  ;;  %v1150_v62 = vld [vmem:[%s1728_s7 + $0x8] sm:$0xff]   ;;  %v1151_v63 = vld [vmem:[%s1728_s7] sm:$0xff]   ;;  %s1431_s7 = smov [#allocation19]  }
 0x4b7   :  { %661 = vrot.lane.b32.xlu0 %v390_v3, %s1416_s24 }
 0x4b8   :  { %v389_v9 = vpack.c.bf16 %v384_v5, %v383_v8  ;;  %v387_v10 = vpack.c.bf16 %v380_v4, %v379_v6 }
 0x4ba   :  { %608 = vrot.lane.b32.xlu1 %v387_v10, %s1416_s24 }
 0x4bb   :  { %659 = vrot.lane.b32.xlu0 %v389_v9, %s1416_s24 }
 0x4bf   :  { %v1157_v11 = vpop.eup %1156 }
 0x4c0   :  { %v1159_v12 = vpop.eup %1158 }
 0x4c1   :  { %1073 = vmatprep.mubr.msk.f32.mxu1 %vm182_vm0, %v1159_v12 }
 0x4c2   :  { %1074 = vmatmul.mubr.msk.f32.vlgmr.msra.gmra.mxu1 %vm182_vm0, %v1157_v11 }
 0x4c3   :  { %1088 = vmatprep.mubr.msk.bf16.mxu1 %vm1425_vm1, %v1424_v7 }
 0x528   :  { %v611_v23 = vpop.permute.xlu1 %610 }
 0x529   :  { %v662_v25 = vpop.permute.xlu0 %661  ;;  %1077 = vmatpush3.bf16.msra.mxu0 %v611_v23 }
 0x52a   :  { %1085 = vmatpush3.bf16.msra.mxu1 %v662_v25  ;;  %1078 = vmatprep.subr.bf16.mxu0 %v1424_v7 }
 0x52b   :  { %1086 = vmatprep.subr.bf16.mxu1 %v1424_v7 }
 0x52c   :  { %v609_v13 = vpop.permute.xlu1 %608 }
 0x52d   :  { %v660_v14 = vpop.permute.xlu0 %659  ;;  %1079 = vmatpush3.bf16.msra.mxu0 %v609_v13 }
 0x52e   :  { %1087 = vmatpush3.bf16.msra.mxu1 %v660_v14  ;;  %1092 = vmatprep.subr.bf16.mxu0 %v1424_v7 }
 0x52f   :  { %1100 = vmatprep.subr.bf16.mxu1 %v1424_v7 }
 0x582   :  { %v1075_v15 = vpop.f32.mrf.mxu1 }
 0x583   :  { %1160 = vrcp.f32 %v1075_v15 }
 0x584   :  { %v591_v16 = vpop.f32.mrf.mxu1 }
 0x585   :  { %1162 = vrcp.f32 %v591_v16 }
 0x590   :  { %v1161_v17 = vpop.eup %1160 }
 0x591   :  { %v603_v18 = vmul.f32 %v1161_v17, %v1157_v11 }
 0x592   :  { %v1163_v19 = vpop.eup %1162 }
 0x593   :  { %v605_v20 = vpack.c.bf16 %v603_v18, %v603_v18  ;;  %v602_v21 = vmul.f32 %v1163_v19, %v1159_v12 }
 0x595   :  { %1089 = vmatmul.mubr.msk.bf16.vlgmr.msra.gmra.mxu1 %vm182_vm0, %v605_v20  ;;  %v604_v24 = vpack.c.bf16 %v602_v21, %v602_v21 }
 0x596   :  { %1104 = vmatprep.mubr.msk.bf16.mxu1 %vm1425_vm1, %v1424_v7 }
 0x597   :  { %1081 = vmatmul.mubr.msk.bf16.vlgmr.msra.gmra.mxu0 %vm182_vm0, %v604_v24 }
 0x598   :  { %1093 = vmatpush3.bf16.msra.mxu0 %v1144_v22  ;;  %1096 = vmatprep.mubr.msk.bf16.mxu0 %vm1425_vm1, %v1424_v7 }
 0x599   :  { %1094 = vmatprep.subr.bf16.mxu0 %v1424_v7 }
 0x59c   :  { %1095 = vmatpush3.bf16.msra.mxu0 %v1145_v26 }
 0x59d   :  { %1108 = vmatprep.subr.bf16.mxu0 %v1424_v7 }
 0x655   :  { %v702_v27 = vpop.f32.mrf.mxu1 }
 0x657   :  { %v651_v28 = vpop.f32.mrf.mxu0  ;;  %v1090_v29 = vpop.f32.mrf.mxu1 }
 0x658   :  { %v708_v31 = vpack.c.bf16 %v702_v27, %v651_v28 }
 0x659   :  { %v1082_v30 = vpop.f32.mrf.mxu0  ;;  %v705_v32 = vpop.f32.mrf.mxu1 }
 0x65a   :  { %1097 = vmatmul.mubr.msk.bf16.vlgmr.msra.gmra.mxu0 %vm182_vm0, %v708_v31 }
 0x65b   :  { %v654_v33 = vpop.f32.mrf.mxu0  ;;  %v1091_v34 = vpop.f32.mrf.mxu1  ;;  %1116 = vmatprep.mubr.msk.bf16.mxu0 %vm1425_vm1, %v1424_v7  ;;  %1109 = vmatpush3.bf16.msra.mxu0 %v1148_v60 }
 0x65c   :  { %1110 = vmatprep.subr.bf16.mxu0 %v1424_v7 }
 0x65d   :  { %v1083_v35 = vpop.f32.mrf.mxu0 }
 0x65f   :  { %1111 = vmatpush3.bf16.msra.mxu0 %v1149_v61 }
 0x660   :  { %1112 = vmatprep.subr.bf16.mxu0 %v1424_v7 }
 0x663   :  { %1113 = vmatpush3.bf16.msra.mxu0 %v1150_v62 }
 0x664   :  { %1114 = vmatprep.subr.bf16.mxu0 %v1424_v7 }
 0x667   :  { %1115 = vmatpush3.bf16.msra.mxu0 %v1151_v63 }
 0x71a   :  { %v762_v36 = vpop.f32.mrf.mxu0 }
 0x71b   :  { %v1679_v37 = vadd.f32 %v762_v36, %v1556_v0  ;;  %v1146_v0 = vld [vmem:[#allocation13 + $0x8] sm:$0xff]  }
 0x71c   :  { %v1098_v38 = vpop.f32.mrf.mxu0  ;;  %1101 = vmatpush3.bf16.msra.mxu1 %v1146_v0 }
 0x71d   :  { %v771_v39 = vmul.f32 %v1679_v37, %v1679_v37  ;;  %1102 = vmatprep.subr.bf16.mxu1 %v1424_v7 }
 0x71e   :  { %v765_v40 = vpop.f32.mrf.mxu0 }
 0x71f   :  { %v1684_v41 = vadd.f32 %v765_v40, %v1558_v1  ;;  %v773_v42 = vsel %vm182_vm0, %v771_v39, 0.0 }
 0x720   :  { %774 = vadd.xlane.f32.xlu1 %v773_v42  ;;  %v1099_v43 = vpop.f32.mrf.mxu0  ;;  %1103 = vmatpush3.bf16.msra.mxu1 %v1147_v46 }
 0x721   :  { %v772_v44 = vmul.f32 %v1684_v41, %v1684_v41 }
 0x723   :  { %v776_v45 = vsel %vm182_vm0, %v772_v44, 0.0 }
 0x724   :  { %777 = vadd.xlane.f32.xlu0 %v776_v45 }
 0x7a9   :  { %v775_v47 = vpop.xlane.xlu1 %774 }
 0x7aa   :  { %v779_v48 = vmul.f32 0.03125, %v775_v47 }
 0x7ac   :  { %v781_v1 = vadd.f32 1e-06, %v779_v48 }
 0x7ad   :  { %v778_v49 = vpop.xlane.xlu0 %777 }
 0x7ae   :  { %1164 = vrsqrt.f32 %v781_v1  ;;  %v780_v50 = vmul.f32 0.03125, %v778_v49 }
 0x7b0   :  { %v782_v51 = vadd.f32 1e-06, %v780_v50 }
 0x7b2   :  { %1166 = vrsqrt.f32 %v782_v51 }
 0x7bb   :  { %v1165_v52 = vpop.eup %1164 }
 0x7bc   :  { %v785_v53 = vmul.f32 %v1165_v52, %v1679_v37 }
 0x7be   :  { %v794_v57 = vmul.f32 %v998_v55, %v785_v53 }
 0x7bf   :  { %v1167_v54 = vpop.eup %1166 }
 0x7c0   :  { %v786_v56 = vmul.f32 %v1167_v54, %v1684_v41 }
 0x7c2   :  { %v795_v58 = vmul.f32 %v998_v55, %v786_v56 }
 0x7c4   :  { %v796_v59 = vpack.c.bf16 %v795_v58, %v794_v57 }
 0x7c6   :  { %1105 = vmatmul.mubr.msk.bf16.vlgmr.msra.gmra.mxu1 %vm182_vm0, %v796_v59 }
 0x886   :  { %v850_v2 = vpop.f32.mrf.mxu1 }
 0x887   :  { %873 = vrot.lane.b32.xlu0 %v850_v2, %s1416_s24  ;;  %v1002_v6 = vmul.f32 -1.442695, %v850_v2 }
 0x888   :  { %v1106_v3 = vpop.f32.mrf.mxu1 }
 0x889   :  { %1168 = vpow2.f32 %v1002_v6 }
 0x88a   :  { %v853_v4 = vpop.f32.mrf.mxu1 }
 0x88b   :  { %875 = vrot.lane.b32.xlu1 %v853_v4, %s1416_s24  ;;  %v1003_v8 = vmul.f32 -1.442695, %v853_v4  ;;  %s968_s24 = sshll.u32 %s1431_s7, 4  ;;  %s969_s24 = int_to_ptr.vmem [resolvable:$true] %s968_s24 }
 0x88c   :  { %v1107_v5 = vpop.f32.mrf.mxu1  ;;  %s1376_s1 = scalar_lea.vmem %s969_s24, 256  ;;  %p1381_p9 = scmp.lt.s32.totalorder %s969_s24, %s969_s24 }
 0x88d   :  { %1170 = vpow2.f32 %v1003_v8  ;;  %p1377_p8 = scmp.ne.s32.totalorder %s969_s24, %s1376_s1  ;;  %p1382_p10 = scmp.lt.s32.totalorder %s1376_s1, %s1376_s1 }
 0x88f   :  { %p1383_p11 = por %p1382_p10, %p1381_p9 }
 0x891   :  { %p1384_p12 = pnand %p1383_p11, %p1377_p8 }
 0x896   :  { %v1169_v9 = vpop.eup %1168 }
 0x897   :  { %v863_v7 = vadd.f32 1.0, %v1169_v9 }
 0x899   :  { %1172 = vrcp.f32 %v863_v7 }
 0x89a   :  { %v1171_v10 = vpop.eup %1170 }
 0x89b   :  { %v864_v11 = vadd.f32 1.0, %v1171_v10 }
 0x89d   :  { %1174 = vrcp.f32 %v864_v11 }
 0x8a6   :  { %v1173_v12 = vpop.eup %1172 }
 0x8a7   :  { %v869_v13 = vmul.f32 %v1173_v12, %v850_v2 }
 0x8aa   :  { %v1175_v23 = vpop.eup %1174 }
 0x8ab   :  { %v870_v14 = vmul.f32 %v1175_v23, %v853_v4 }
 0x8f9   :  { %v874_v25 = vpop.permute.xlu0 %873 }
 0x8fa   :  { %v879_v16 = vmul.f32 %v874_v25, %v869_v13 }
 0x8fd   :  { %v876_v15 = vpop.permute.xlu1 %875 }
 0x8fe   :  { %v880_v17 = vmul.f32 %v876_v15, %v870_v14 }
 0x900   :  { %v881_v18 = vpack.c.bf16 %v880_v17, %v879_v16 }
 0x902   :  { %1117 = vmatmul.mubr.msk.bf16.vlgmr.msra.gmra.mxu0 %vm914_vm3, %v881_v18 }
 0x9c2   :  { %v952_v19 = vpop.f32.mrf.mxu0 }
 0x9c3   :  { %v959_v20 = vadd.f32 %v952_v19, %v1679_v37 }
 0x9c4   :  { %v1118_v21 = vpop.f32.mrf.mxu0 }
 0x9c5   :  { %961 = vst.msk [vmem:[#allocation19] sm:$0xff] %vm182_vm0, %v959_v20 }
 0x9c6   :  { %v955_v22 = vpop.f32.mrf.mxu0 }
 0x9c7   :  { %v960_v24 = vadd.f32 %v955_v22, %v1684_v41 }
 0x9c8   :  { %v1119_v26 = vpop.f32.mrf.mxu0 }
 0x9c9   :  { %962 = vst.msk [vmem:[#allocation19 + $0x8] sm:$0xff] %vm182_vm0, %v960_v24 }
 0x9ca   :  { %1387 = shalt.err (!%p1384_p12)
}
 0x9cb   :  { %974 = dma.vmem_to_hbm [thread:$0]  %s969_s24, 256, %s1734_s13, [#allocation4], %s1412_s30, %s1412_s30, %s1413_s14  }
 0x9cc   :  { %1408 = dma.done.wait [#allocation4], 256  }
 0x9cd   :  { %1409 = vsyncadd [#allocation4], 4294967040 }
 0x9ce   :  { %978 = vsyncpa [#allocation3], 1 }
 0x9cf   :  { %979 = vsyncpa [#allocation6], 1 }
 0x9d0   :  { %980 = vsyncpa [#allocation9], 1 }
 0x9d1   :  { %981 = vsyncpa [#allocation12], 1 }
 0x9d2   :  { %982 = vsyncpa [#allocation15], 1 }
 0x9d3   :  { %983 = vsyncpa [#allocation18], 1 }
 0x9d4   :  { %984 = vsyncpa [#allocation4], 1 }

</bundles_post_ra>
